<compile_context>
chip_gen: v7x
topology: tpu7x:2x2x1
jax: 0.10.0
libtpu: 0.0.40
codegen_flags: <defaults>
</compile_context>

<pallas_src>
import jax
import jax.numpy as jnp
from jax.experimental import pallas as pl
from jax.experimental.pallas import tpu as pltpu

_LANE = 128
_MAX_DMA_CHUNKS = 8  # concurrent HBM->HBM DMAs on the fallback path


def _budgets():
    """Returns (tile_cap_bytes, vmem_limit_bytes) tuned per TPU generation."""
    try:
        vmem_cap = int(getattr(pltpu.get_tpu_info(), "vmem_capacity_bytes", 0))
    except Exception:  # info query unavailable -> conservative defaults
        vmem_cap = 0
    if vmem_cap >= 128 * 1024 * 1024:
        # v5e / v6e: 128 MiB physical VMEM. 2 in + 2 out buffers x 16 MiB = 64 MiB.
        return 16 * 1024 * 1024, 72 * 1024 * 1024
    # v7x (64 MiB physical per TC) and unknown chips: 4 x 8 MiB = 32 MiB.
    return 8 * 1024 * 1024, 48 * 1024 * 1024


# --------------------------------------------------------------------------
# Path A: tiled, auto-pipelined VMEM copy (lane-dense blocks).
# --------------------------------------------------------------------------
def _copy_kernel(x_ref, o_ref):
    # Pass-through: the reference forward performs no computation.
    o_ref[...] = x_ref[...]


def _tiled_copy(x2d, *, donate):
    rows, lane = x2d.shape
    itemsize = x2d.dtype.itemsize
    sub = max(8, 32 // itemsize)  # dtype-aware sublane multiple (8 f32 / 16 bf16 / 32 i8)
    tile_cap, vmem_limit = _budgets()

    if rows <= sub:
        tile_rows = rows  # full row extent: always a legal block shape
    else:
        cap_rows = max(sub, (tile_cap // (lane * itemsize)) // sub * sub)
        tile_rows = min(rows, cap_rows)
        tile_rows = max(sub, (tile_rows // sub) * sub)  # align to sublane multiple
        # Megacore (v7x): keep at least 2 grid blocks for non-trivial inputs so
        # both TensorCores' DMA queues issue; halves aggregate per-step overhead.
        if rows >= 2 * sub and pl.cdiv(rows, tile_rows) < 2:
            half = (rows + 1) // 2
            tile_rows = max(sub, (half // sub) * sub)

    grid = (pl.cdiv(rows, tile_rows),)  # last partial block handled by Pallas
    extra = {"input_output_aliases": {0: 0}} if donate else {}

    return pl.pallas_call(
        _copy_kernel,
        out_shape=jax.ShapeDtypeStruct((rows, lane), x2d.dtype),
        grid=grid,
        in_specs=[pl.BlockSpec((tile_rows, lane), lambda i: (i, 0))],
        out_specs=pl.BlockSpec((tile_rows, lane), lambda i: (i, 0)),
        compiler_params=pltpu.CompilerParams(
            dimension_semantics=("parallel",),  # shard the 1-D copy over v7x's 2 TCs
            vmem_limit_bytes=vmem_limit,
        ),
        # Pure memory traffic: let XLA overlap this custom call with neighbors.
        cost_estimate=pl.CostEstimate(
            flops=0, transcendentals=0,
            bytes_accessed=2 * rows * lane * itemsize),
        **extra,
    )(x2d)


# --------------------------------------------------------------------------
# Path B: whole-array chunked HBM->HBM DMA (no pad / slice / relayout).
# --------------------------------------------------------------------------
def _make_dma_copy_kernel(nchunks):
    def kernel(x_hbm, o_hbm, sems):
        d0 = x_hbm.shape[0]
        bounds = [(i * d0) // nchunks for i in range(nchunks + 1)]  # static
        started = []
        for i in range(nchunks):
            s, e = bounds[i], bounds[i + 1]
            if e > s:
                cp = pltpu.make_async_copy(x_hbm.at[s:e], o_hbm.at[s:e], sems.at[i])
                cp.start()
                started.append(cp)
        for cp in started:
            cp.wait()
    return kernel


def _dma_copy(x):
    orig_shape = x.shape
    if x.ndim == 0:
        x = x.reshape(1)  # free for size-1 arrays
    d0 = int(x.shape[0])
    nchunks = max(1, min(d0, _MAX_DMA_CHUNKS))
    n_bytes = x.size * x.dtype.itemsize
    y = pl.pallas_call(
        _make_dma_copy_kernel(nchunks),
        out_shape=jax.ShapeDtypeStruct(x.shape, x.dtype),
        in_specs=[pl.BlockSpec(memory_space=pl.ANY)],
        out_specs=pl.BlockSpec(memory_space=pl.ANY),
        scratch_shapes=[pltpu.SemaphoreType.DMA((nchunks,))],
        cost_estimate=pl.CostEstimate(
            flops=0, transcendentals=0, bytes_accessed=2 * n_bytes),
    )(x)
    return y.reshape(orig_shape)


# --------------------------------------------------------------------------
# Dispatch wrapper.
# --------------------------------------------------------------------------
def _passthrough_pallas(x, *, donate=False):
    """Device round-trip copy of `x` (bit-exact) with no extra HBM traffic."""
    if x.size == 0:
        return x  # zero-element guard: nothing to copy, avoid empty grid

    itemsize = x.dtype.itemsize
    sub = max(8, 32 // itemsize)
    tile_cap, _ = _budgets()

    # "Collapsible" = leading dims can be merged into the second-to-last dim
    # without changing the TPU (sublane, 128)-tiled byte layout, i.e. the
    # wrapper reshape is free. This is the typical (B, S, H) encoder case.
    collapsible = (
        x.ndim >= 2
        and x.shape[-1] % _LANE == 0
        and (x.ndim == 2 or x.shape[-2] % sub == 0)
        and sub * x.shape[-1] * itemsize <= tile_cap  # minimal legal tile fits budget
    )
    if collapsible:
        lane = x.shape[-1]
        rows = x.size // lane
        y2d = _tiled_copy(x.reshape(rows, lane), donate=donate)
        return y2d.reshape(x.shape)

    # Ragged / non-collapsible shapes: chunked HBM->HBM DMA. No wrapper pad,
    # slice or relayout. Donation is intentionally skipped here (an aliased
    # src == dst DMA would be a pointless self-copy).
    return _dma_copy(x)


class Encoder:
    """JAX/Pallas port of the (stub) PyTorch Encoder module."""

    def __init__(self, num_blocks: int = 6, device_copy: bool = False,
                 donate_input: bool = False) -> None:
        self.num_blocks = num_blocks      # kept for parity with reference __init__
        self.device_copy = device_copy
        # Only honored on the tiled path; donating halves HBM footprint but the
        # caller must not need the original x alive alongside the copy.
        self.donate_input = donate_input

    def forward(self, x):
        # Reference forward is `pass` (no computation).  Fast path (default):
        # return x unchanged — no kernel launch, no HBM read/write.
        if not self.device_copy:
            return x
        return _passthrough_pallas(x, donate=self.donate_input)

    def __call__(self, x):
        return self.forward(x)


if __name__ == "__main__":
    key = jax.random.PRNGKey(0)
    k1, k2, k3 = jax.random.split(key, 3)

    # SMALL typical encoder activations: batch=2, seq=8, hidden=128.
    x = jax.random.normal(k1, (2, 8, 128), dtype=jnp.float32)

    # Default (optimal) path: identity with no kernel launch at all.
    enc = Encoder(num_blocks=6)
    y_fast = enc(x)
    assert y_fast.shape == x.shape
    assert bool(jnp.all(y_fast == x))

    # Path A: lane-dense tiled VMEM copy, >= 2 grid blocks.
    enc_copy = Encoder(num_blocks=6, device_copy=True)
    y = jax.block_until_ready(enc_copy(x))
    assert y.shape == x.shape and y.dtype == x.dtype
    assert bool(jnp.all(y == x))

    # Path A with bf16 (exercises dtype-aware sublane multiple of 16).
    xb = jax.random.normal(k2, (2, 16, 256), dtype=jnp.float32).astype(jnp.bfloat16)
    yb = jax.block_until_ready(enc_copy(xb))
    assert yb.shape == xb.shape and yb.dtype == xb.dtype
    assert bool(jnp.all(yb == xb))

    # Path B: ragged / non-lane-aligned shape -> chunked HBM->HBM DMA copy.
    xr = jax.random.normal(k3, (3, 5, 7), dtype=jnp.float32)
    yr = jax.block_until_ready(enc_copy(xr))
    assert yr.shape == xr.shape and yr.dtype == xr.dtype
    assert bool(jnp.all(yr == xr))

    print("KERNEL_OK")
</pallas_src>

<mosaic_0001>
module attributes {stable_mosaic.version = 11 : i64} {
  func.func @_copy_kernel(%arg0: i32, %arg1: memref<8x128xf32, #tpu.memory_space<vmem>>, %arg2: memref<8x128xf32, #tpu.memory_space<vmem>>) attributes {dimension_semantics = [#tpu.dimension_semantics<parallel>], iteration_bounds = array<i64: 2>, scalar_prefetch = 0 : i64, scratch_operands = 0 : i64, tpu.core_type = #tpu.core_type<tc>, window_params = [{transform_indices = @transform_0, window_bounds = array<i64: 8, 128>}, {transform_indices = @transform_1, window_bounds = array<i64: 8, 128>}]} {
    %c0 = arith.constant 0 : index
    %c0_0 = arith.constant 0 : index
    %0 = vector.load %arg1[%c0, %c0_0] : memref<8x128xf32, #tpu.memory_space<vmem>>, vector<8x128xf32>
    %c0_1 = arith.constant 0 : index
    %c0_2 = arith.constant 0 : index
    %1 = vector.load %arg2[%c0_1, %c0_2] : memref<8x128xf32, #tpu.memory_space<vmem>>, vector<8x128xf32>
    tpu.vector_store %arg2[%c0_1, %c0_2], %0 {strides = array<i32>} : memref<8x128xf32, #tpu.memory_space<vmem>>, vector<8x128xf32>,
    return
  }
  func.func @transform_0(%arg0: i32) -> (i32, i32) {
    %c0_i32 = arith.constant 0 : i32
    %c0_i32_0 = arith.constant 0 : i32
    return %arg0, %c0_i32 : i32, i32
  }
  func.func @transform_1(%arg0: i32) -> (i32, i32) {
    %c0_i32 = arith.constant 0 : i32
    %c0_i32_0 = arith.constant 0 : i32
    return %arg0, %c0_i32 : i32, i32
  }
}

</mosaic_0001>

<bundles_post_ra>
// kernel: tpu_custom_call.1
= control target key start
LH: loop header
LB: loop body
LE: loop exit
PB: predicated region body
PF: predicated region fallthrough
CT: control target
= control target key end

     0   :  { %6 = vsyncpa [#allocation3], 0  ;;  %s547_s0 = inlined_call_operand.hbm [shape: f32[16,128], index: 0, kind: input, shape index: {}]   ;;  %s548_s1 = inlined_call_operand.hbm [shape: f32[16,128], index: 1, kind: output, shape index: {}]  }
   0x1   :  { %8 = vsyncpa [#allocation3 + $0x1], 0 }
   0x2   :  { %9 = vsyncpa [#allocation4], 0 }
   0x3   :  { %11 = vsyncpa [#allocation4 + $0x1], 0  ;;  %s386_s6 = smov 0   ;;  %s388_s7 = smov 0  }
   0x4   :  { %s390_s8 = smov 0   ;;  %s392_s9 = smov 0  }
   0x5 LB: > { %s407_s10 = sadd.s32 4294967295, %s372_s9   ;;  %s218_s11 = sadd.s32 4294967294, %s372_s9   ;;  %s372_s9 = sphi %s392_s9, %s563_s9   ;;  %s368_s8 = sphi %s390_s8, %s562_s8   ;;  %s364_s7 = sphi %s388_s7, %s561_s7   ;;  %s360_s6 = sphi %s386_s6, %s560_s6  }
   0x6   : > { %s411_s12 = sadd.s32 1, %s372_s9   ;;  %s24_s13 = sadd.s32 1, %s368_s8 }
   0x7   : > { %s21_s14 = ssub.s32 %s372_s9, %s411_s12  ;;  %p31_p0 = scmp.ne.s32.totalorder %s368_s8, %s364_s7 }
   0x8   : > { %p22_p1 = scmp.eq.s32.totalorder %s21_s14, 0  ;;  %p32_p2 = scmp.eq.s32.totalorder %s372_s9, 0 }
   0x9   : > { %p37_p3 = scmp.ne.s32.totalorder %s364_s7, %s360_s6  ;;  %p38_p4 = scmp.eq.s32.totalorder %s407_s10, 0 }
   0xa   : > { %s423_s15 = scalar_select %p22_p1, %s368_s8, %s24_s13  }
   0xb   : > { %p425_p5 = por %p32_p2, %p31_p0  ;;  %p429_p6 = por %p38_p4, %p37_p3 }
   0xc   : > { %p61_p7 = scmp.eq.s32.totalorder %s407_s10, 1  ;;  %p67_p8 = scmp.eq.s32.totalorder %s218_s11, 1 }
   0xd   : > { %p242_p10 = scmp.lt.s32.totalorder %s372_s9, 2  ;;  %s87_s20 = sand.u32 1, %s368_s8  }
   0xe   : > { %p436_p11 = por %p61_p7, %p31_p0  ;;  %p440_p12 = por %p67_p8, %p37_p3 }
   0xf   : > { %s222_s21 = sshll.u32 %s372_s9, 7  ;;  %s221_s22 = sshll.u32 %s87_s20, 3 }
  0x10   : > { %s552_s18 = scalar_select %p436_p11, 1, 0 }
  0x11   : > { %s553_s19 = scalar_select %p440_p12, 1, 0 }
  0x12   : > { %s449_s25 = scalar_lea.hbm %s547_s0, %s222_s21  ;;  %s91_s26 = scalar_lea.vmem [#allocation2], %s221_s22 }
  0x13   : > { %s98_s27 = sshll.u32 %s91_s26, 4  ;;  %p453_p13 = pnand %p242_p10, %p425_p5  ;;  %s457_s27 = int_to_ptr.vmem [resolvable:$true] %s98_s27 }
  0x14   : > { %s88_s29 = scalar_lea.sflag [#allocation3], %s87_s20  ;;  %s276_s30 = scalar_lea.hbm %s449_s25, 128 }
  0x15   : > { %p277_p2 = scmp.ne.s32.totalorder %s449_s25, %s276_s30  ;;  %p278_p3 = pneg %p453_p13 }
  0x16   : > { %s281_s4 = scalar_lea.hbm %s547_s0, 256  ;;  %p282_p5 = scmp.lt.u32.totalorder %s449_s25, %s547_s0 }
  0x17   : > { %p279_p4 = pnand %p278_p3, %p277_p2  ;;  %p283_p8 = scmp.lt.u32.totalorder %s281_s4, %s276_s30 }
  0x18   : > { %p285_p9 = scmp.lt.u32.totalorder %s276_s30, %s449_s25 }
  0x19   : > { %p280_p7 = pneg %p279_p4  ;;  %p284_p10 = por %p283_p8, %p282_p5 }
  0x1b   : > { %p286_p0 = por %p285_p9, %p284_p10 }
  0x1d   : > { %p287_p1 = pnand %p286_p0, %p280_p7 }
  0x1f   : > { %290 = shalt.err (!%p287_p1)
}
  0x20   : > { %s291_s13 = scalar_lea.vmem %s457_s27, 128  ;;  %s374_s14 = smov [#allocation2]  }
  0x21   : > { %p292_p2 = scmp.ne.s32.totalorder %s457_s27, %s291_s13  ;;  %s296_s16 = sshll.u32 %s374_s14, 4  ;;  %s297_s16 = int_to_ptr.vmem [resolvable:$false] %s296_s16 }
  0x22   : > { %s298_s20 = scalar_lea.vmem %s297_s16, 256  ;;  %p299_p11 = scmp.lt.s32.totalorder %s457_s27, %s297_s16 }
  0x23   : > { %p294_p4 = pnand %p292_p2, %p278_p3  ;;  %p300_p5 = scmp.lt.s32.totalorder %s298_s20, %s291_s13 }
  0x25   : > { %p295_p12 = pneg %p294_p4  ;;  %p301_p8 = por %p300_p5, %p299_p11 }
  0x27   : > { %p302_p9 = pnand %p301_p8, %p295_p12 }
  0x29   : > { %305 = shalt.err (!%p302_p9)
}
  0x2a   : > { %237 = dma.hbm_to_vmem [thread:$0]  (!%p453_p13), %s449_s25, 128, %s457_s27, %s88_s29  }
  0x2b   : > { %p555_p0 = scmp.lt.s32.totalorder %s372_s9, 3  ;;  %p556_p1 = scmp.ge.s32.totalorder %s372_s9, 1 }
  0x2d   : > { %p104_p3 = pnand %p556_p1, %p555_p0 }
  0x2e   : > { %s491_s21 = sand.u32 (!%p104_p3), 1, %s364_s7  }
  0x2f   : > { %107 = sbr.rel (%p104_p3) target bundleno = 81 (0x51), region = 24  ;;  %s224_s22 = sshll.u32 (!%p104_p3), %s491_s21, 3 }
  0x30   : > { %s110_s23 = scalar_lea.sflag (!%p104_p3), [#allocation3], %s491_s21  ;;  %s113_s24 = scalar_lea.vmem (!%p104_p3), [#allocation2], %s224_s22 }
  0x36   : > { %351 = dma.done.wait (%p429_p6), %s110_s23, 128  }
  0x37   : > { %353 = vsyncadd (%p429_p6), %s110_s23, 4294967168  ;;  %s131_s25 = scalar_lea.vmem [#allocation5], %s224_s22  ;;  %s227_s27 = sshll.u32 %s407_s10, 7  ;;  %v132_v0 = vld [vmem:[%s113_s24] sm:$0xff] }
  0x38   : > { %s148_s26 = sshll.u32 %s131_s25, 4  ;;  %s505_s30 = scalar_lea.hbm %s548_s1, %s227_s27  ;;  %133 = vst [vmem:[%s131_s25] sm:$0xff] %v132_v0  ;;  %s500_s26 = int_to_ptr.vmem [resolvable:$true] %s148_s26 }
  0x39   : > { %s135_s17 = scalar_lea.sflag [#allocation4], %s491_s21  ;;  %s306_s2 = scalar_lea.vmem %s500_s26, 128 }
  0x3a   : > { %p307_p6 = scmp.ne.s32.totalorder %s500_s26, %s306_s2  ;;  %p557_p11 = scmp.ne.s32.totalorder %s552_s18, 0 }
  0x3b   : > { %s375_s3 = smov [#allocation5]  }
  0x3c   : > { %p308_p12 = pnand %p307_p6, %p557_p11  ;;  %s310_s10 = sshll.u32 %s375_s3, 4  ;;  %s311_s10 = int_to_ptr.vmem [resolvable:$false] %s310_s10 }
  0x3d   : > { %s312_s4 = scalar_lea.vmem %s311_s10, 256  ;;  %p313_p7 = scmp.lt.s32.totalorder %s500_s26, %s311_s10 }
  0x3e   : > { %p309_p13 = pneg %p308_p12  ;;  %p314_p10 = scmp.lt.s32.totalorder %s312_s4, %s306_s2 }
  0x40   : > { %p315_p2 = por %p314_p10, %p313_p7 }
  0x42   : > { %p316_p4 = pnand %p315_p2, %p309_p13 }
  0x44   : > { %319 = shalt.err (!%p316_p4)
}
  0x45   : > { %s320_s5 = scalar_lea.hbm %s505_s30, 128  ;;  %s324_s14 = scalar_lea.hbm %s548_s1, 256 }
  0x46   : > { %p321_p5 = scmp.ne.s32.totalorder %s505_s30, %s320_s5  ;;  %p325_p0 = scmp.lt.u32.totalorder %s505_s30, %s548_s1 }
  0x47   : > { %p326_p1 = scmp.lt.u32.totalorder %s324_s14, %s320_s5  ;;  %p328_p6 = scmp.lt.u32.totalorder %s320_s5, %s505_s30 }
  0x48   : > { %p322_p8 = pnand %p321_p5, %p557_p11 }
  0x49   : > { %p327_p3 = por %p326_p1, %p325_p0 }
  0x4a   : > { %p323_p9 = pneg %p322_p8 }
  0x4b   : > { %p329_p12 = por %p328_p6, %p327_p3 }
  0x4d   : > { %p330_p13 = pnand %p329_p12, %p323_p9 }
  0x4f   : > { %333 = shalt.err (!%p330_p13)
}
  0x50   : > { %232 = dma.vmem_to_hbm [thread:$0]  (%p557_p11), %s500_s26, 128, %s505_s30, %s135_s17  }
  0x51 PF: > { %s160_s21 = sand.u32 1, %s360_s6   ;;  %p558_p7 = scmp.ne.s32.totalorder %s553_s19, 0 }
  0x52   : > { %p559_p10 = scmp.ge.s32.totalorder %s372_s9, 2  ;;  %s161_s22 = scalar_lea.sflag [#allocation4], %s160_s21 }
  0x54   : > { %p239_p2 = pnand %p559_p10, %p558_p7 }
  0x56   : > { %355 = dma.done.wait (!%p239_p2), %s161_s22, 128  }
  0x57   : > { %357 = vsyncadd (!%p239_p2), %s161_s22, 4294967168  ;;  %p14_p4 = scmp.ge.s32.totalorder %s411_s12, 4   ;;  %s560_s6 = smov %s364_s7 }
  0x58   : > { %s561_s7 = smov %s368_s8  ;;  %s562_s8 = smov %s423_s15 }
  0x59   : > { %s563_s9 = smov %s411_s12  ;;  %16 = sbr.rel (!%p14_p4) target bundleno = 5 (0x5), region = 69 }
  0x60   :  { %166 = vsyncpa [#allocation3], 1 }
  0x61   :  { %168 = vsyncpa [#allocation3 + $0x1], 1 }
  0x62   :  { %169 = vsyncpa [#allocation4], 1 }
  0x63   :  { %171 = vsyncpa [#allocation4 + $0x1], 1 }

</bundles_post_ra>
